<compile_context>
chip_gen: v6e
topology: v6e:2x2x1
jax: 0.10.0
libtpu: 0.0.40
codegen_flags: <defaults>
</compile_context>

<pallas_src>
import numpy as np
import jax
import jax.numpy as jnp
from jax.experimental import pallas as pl
from jax.experimental.pallas import tpu as pltpu

_LANE = 128
_SUBLANE = 8


def _adaptive_bins(length, level):
    """PyTorch adaptive_pool1d bin boundaries: [floor(i*L/level), ceil((i+1)*L/level))."""
    starts = [(i * length) // level for i in range(level)]
    ends = [-(-((i + 1) * length) // level) for i in range(level)]
    return starts, ends


def _round_up(x, m):
    return -(-x // m) * m


def _choose_row_tile(n, l, itemsize):
    """Pick a row-tile TM (multiple of 8) so 2 double-buffered (TM, L) x tiles stay
    well under the scoped-VMEM default (budget ~16 MiB), also safe on v7x (64 MiB)."""
    budget = 16 * 1024 * 1024
    rows = budget // max(1, 2 * l * itemsize)
    rows = max(_SUBLANE, min(512, (rows // _SUBLANE) * _SUBLANE))
    return min(rows, _round_up(n, _SUBLANE))


def _avg_pool_kernel(x_ref, w_ref, s_ref, o_ref):
    # x_ref: (TM, L); w_ref: (L, T_pad) {0,1} bin membership; s_ref: (1, T_pad) f32 1/binwidth
    acc = jnp.dot(x_ref[...], w_ref[...], preferred_element_type=jnp.float32)
    o_ref[...] = (acc * s_ref[...]).astype(o_ref.dtype)


def _make_max_pool_kernel(bins, t_pad):
    n_bins = len(bins)

    def _max_pool_kernel(x_ref, o_ref):
        # x_ref: (TM, L); o_ref: (TM, T_pad) — one lane-dense store, static bin slices.
        x = x_ref[...]
        cols = [jnp.max(x[:, s:e], axis=1, keepdims=True) for (s, e) in bins]
        out = jnp.concatenate(cols, axis=1)
        if t_pad > n_bins:
            pad = jnp.zeros((out.shape[0], t_pad - n_bins), dtype=out.dtype)
            out = jnp.concatenate([out, pad], axis=1)
        o_ref[...] = out.astype(o_ref.dtype)

    return _max_pool_kernel


def pyramid_pooling_1d(x, levels, pooling="avg"):
    """x: (B, C, L) -> (B, C * sum(levels)), matching the PyTorch module."""
    B, C, L = x.shape
    T = sum(levels)
    N = B * C
    itemsize = jnp.dtype(x.dtype).itemsize

    TM = _choose_row_tile(N, L, itemsize)
    N_pad = _round_up(N, TM)
    T_pad = _round_up(max(T, _LANE), _LANE)

    x2 = x.reshape(N, L)
    if N_pad != N:
        x2 = jnp.pad(x2, ((0, N_pad - N), (0, 0)))

    grid = (N_pad // TM,)
    x_spec = pl.BlockSpec((TM, L), lambda i: (i, 0))
    o_spec = pl.BlockSpec((TM, T_pad), lambda i: (i, 0))
    cparams = pltpu.CompilerParams(dimension_semantics=("parallel",))

    bins = []
    for level in levels:
        starts, ends = _adaptive_bins(L, level)
        bins.extend(zip(starts, ends))

    # TODO(synk): for very large L add a K-tiling grid axis over L (f32 accumulator,
    # pl.when init/finalize) so the resident (L, T_pad) weight / row tiles stay bounded.

    if pooling == "avg":
        W = np.zeros((L, T_pad), dtype=np.float32)
        scale = np.zeros((1, T_pad), dtype=np.float32)
        for col, (s, e) in enumerate(bins):
            W[s:e, col] = 1.0
            scale[0, col] = 1.0 / float(e - s)
        W = jnp.asarray(W, dtype=x.dtype)   # {0,1}: exact even in bf16
        scale = jnp.asarray(scale)          # f32 reciprocal widths applied to f32 accumulator

        cost = pl.CostEstimate(
            flops=2 * N_pad * L * T_pad,
            transcendentals=0,
            bytes_accessed=N_pad * L * itemsize + L * T_pad * itemsize + N_pad * T_pad * itemsize,
        )
        out2 = pl.pallas_call(
            _avg_pool_kernel,
            out_shape=jax.ShapeDtypeStruct((N_pad, T_pad), x.dtype),
            grid=grid,
            in_specs=[
                x_spec,
                pl.BlockSpec((L, T_pad), lambda i: (0, 0)),   # resident weight block
                pl.BlockSpec((1, T_pad), lambda i: (0, 0)),   # resident scale block
            ],
            out_specs=o_spec,
            compiler_params=cparams,
            cost_estimate=cost,
        )(x2, W, scale)
    elif pooling == "max":
        cost = pl.CostEstimate(
            flops=N_pad * L,
            transcendentals=0,
            bytes_accessed=N_pad * L * itemsize + N_pad * T_pad * itemsize,
        )
        out2 = pl.pallas_call(
            _make_max_pool_kernel(tuple(bins), T_pad),
            out_shape=jax.ShapeDtypeStruct((N_pad, T_pad), x.dtype),
            grid=grid,
            in_specs=[x_spec],
            out_specs=o_spec,
            compiler_params=cparams,
            cost_estimate=cost,
        )(x2)
    else:
        raise ValueError(f"Unsupported pooling method: {pooling}")

    # Strip padding and reassemble PyTorch concat order: per level (B, C, level) -> (B, C*level).
    out3 = out2[:N, :T].reshape(B, C, T)
    pieces, off = [], 0
    for level in levels:
        pieces.append(out3[:, :, off:off + level].reshape(B, C * level))
        off += level
    return jnp.concatenate(pieces, axis=1)


def _reference(x, levels, pooling="avg"):
    """Pure-JAX reference of the PyTorch forward, for correctness checking."""
    B, C, L = x.shape
    pieces = []
    for level in levels:
        starts, ends = _adaptive_bins(L, level)
        bins = []
        for s, e in zip(starts, ends):
            seg = x[:, :, s:e]
            bins.append(jnp.mean(seg, axis=-1) if pooling == "avg" else jnp.max(seg, axis=-1))
        pooled = jnp.stack(bins, axis=-1)  # (B, C, level)
        pieces.append(pooled.reshape(B, C * level))
    return jnp.concatenate(pieces, axis=1)


if __name__ == "__main__":
    key = jax.random.PRNGKey(0)
    levels = [1, 2, 4]

    # Case 1: small, even shapes.
    B, C, L = 2, 4, 16
    x = jax.random.normal(key, (B, C, L), dtype=jnp.float32)
    out_avg = jax.block_until_ready(pyramid_pooling_1d(x, levels, pooling="avg"))
    out_max = jax.block_until_ready(pyramid_pooling_1d(x, levels, pooling="max"))
    ref_avg = _reference(x, levels, "avg")
    ref_max = _reference(x, levels, "max")
    assert out_avg.shape == (B, C * sum(levels))
    assert out_max.shape == (B, C * sum(levels))
    np.testing.assert_allclose(np.asarray(out_avg), np.asarray(ref_avg), rtol=1e-5, atol=1e-5)
    np.testing.assert_allclose(np.asarray(out_max), np.asarray(ref_max), rtol=1e-5, atol=1e-5)

    # Case 2: N not a multiple of 8 and uneven (overlapping) adaptive bins.
    key2 = jax.random.PRNGKey(1)
    B2, C2, L2 = 3, 5, 33
    x2 = jax.random.normal(key2, (B2, C2, L2), dtype=jnp.float32)
    out_avg2 = jax.block_until_ready(pyramid_pooling_1d(x2, levels, pooling="avg"))
    out_max2 = jax.block_until_ready(pyramid_pooling_1d(x2, levels, pooling="max"))
    np.testing.assert_allclose(np.asarray(out_avg2), np.asarray(_reference(x2, levels, "avg")),
                               rtol=1e-5, atol=1e-5)
    np.testing.assert_allclose(np.asarray(out_max2), np.asarray(_reference(x2, levels, "max")),
                               rtol=1e-5, atol=1e-5)

    print("KERNEL_OK")
</pallas_src>

<mosaic_0001>
module attributes {stable_mosaic.version = 11 : i64} {
  func.func @_avg_pool_kernel(%arg0: i32, %arg1: memref<8x16xf32, #tpu.memory_space<vmem>>, %arg2: memref<16x128xf32, #tpu.memory_space<vmem>>, %arg3: memref<1x128xf32, #tpu.memory_space<vmem>>, %arg4: memref<8x128xf32, #tpu.memory_space<vmem>>) attributes {dimension_semantics = [#tpu.dimension_semantics<parallel>], iteration_bounds = array<i64: 1>, scalar_prefetch = 0 : i64, scratch_operands = 0 : i64, tpu.core_type = #tpu.core_type<tc>, window_params = [{transform_indices = @transform_0, window_bounds = array<i64: 8, 16>}, {pipeline_mode = #tpu.pipeline_mode<synchronous>, transform_indices = @transform_1, window_bounds = array<i64: 16, 128>}, {pipeline_mode = #tpu.pipeline_mode<synchronous>, transform_indices = @transform_2, window_bounds = array<i64: 1, 128>}, {transform_indices = @transform_3, window_bounds = array<i64: 8, 128>}]} {
    %c0 = arith.constant 0 : index
    %c0_0 = arith.constant 0 : index
    %0 = vector.load %arg1[%c0, %c0_0] : memref<8x16xf32, #tpu.memory_space<vmem>>, vector<8x16xf32>
    %c0_1 = arith.constant 0 : index
    %c0_2 = arith.constant 0 : index
    %1 = vector.load %arg2[%c0_1, %c0_2] : memref<16x128xf32, #tpu.memory_space<vmem>>, vector<16x128xf32>
    %cst = arith.constant dense<0.000000e+00> : vector<8x128xf32>
    %2 = tpu.matmul %0, %1, %cst {dimension_numbers = #tpu.dot_dimension_numbers<[1], [0], [0], [1], [0, 0, 1, 1], [], []>} : vector<8x16xf32>, vector<16x128xf32>, vector<8x128xf32> -> vector<8x128xf32>
    %c0_3 = arith.constant 0 : index
    %c0_4 = arith.constant 0 : index
    %3 = vector.load %arg3[%c0_3, %c0_4] : memref<1x128xf32, #tpu.memory_space<vmem>>, vector<1x128xf32>
    %4 = vector.broadcast %3 : vector<1x128xf32> to vector<8x128xf32>
    %5 = arith.mulf %2, %4 : vector<8x128xf32>
    %c0_5 = arith.constant 0 : index
    %c0_6 = arith.constant 0 : index
    %6 = vector.load %arg4[%c0_5, %c0_6] : memref<8x128xf32, #tpu.memory_space<vmem>>, vector<8x128xf32>
    tpu.vector_store %arg4[%c0_5, %c0_6], %5 {strides = array<i32>} : memref<8x128xf32, #tpu.memory_space<vmem>>, vector<8x128xf32>,
    return
  }
  func.func @transform_0(%arg0: i32) -> (i32, i32) {
    %c0_i32 = arith.constant 0 : i32
    %c0_i32_0 = arith.constant 0 : i32
    return %arg0, %c0_i32 : i32, i32
  }
  func.func @transform_1(%arg0: i32) -> (i32, i32) {
    %c0_i32 = arith.constant 0 : i32
    %c0_i32_0 = arith.constant 0 : i32
    %c0_i32_1 = arith.constant 0 : i32
    return %c0_i32, %c0_i32_0 : i32, i32
  }
  func.func @transform_2(%arg0: i32) -> (i32, i32) {
    %c0_i32 = arith.constant 0 : i32
    %c0_i32_0 = arith.constant 0 : i32
    %c0_i32_1 = arith.constant 0 : i32
    return %c0_i32, %c0_i32_0 : i32, i32
  }
  func.func @transform_3(%arg0: i32) -> (i32, i32) {
    %c0_i32 = arith.constant 0 : i32
    %c0_i32_0 = arith.constant 0 : i32
    return %arg0, %c0_i32 : i32, i32
  }
}

</mosaic_0001>

<bundles_post_ra>
// kernel: tpu_custom_call.1
= control target key start
LH: loop header
LB: loop body
LE: loop exit
PB: predicated region body
PF: predicated region fallthrough
CT: control target
= control target key end

     0   :  { %8 = vsyncpa [#allocation3], 0  ;;  %s267_s0 = inlined_call_operand.hbm [shape: f32[8,16], index: 0, kind: input, shape index: {}]   ;;  %s268_s1 = inlined_call_operand.hbm [shape: f32[16,128], index: 1, kind: input, shape index: {}]   ;;  %s269_s2 = inlined_call_operand.vmem [shape: f32[1,128], index: 2, kind: input, shape index: {}]   ;;  %s270_s3 = inlined_call_operand.hbm [shape: f32[8,128], index: 3, kind: output, shape index: {}]  }
   0x1   :  { %9 = vsyncpa [#allocation6], 0 }
   0x2   :  { %10 = vsyncpa [#allocation4], 0  ;;  %s228_s12 = smov [#allocation2]   ;;  %s229_s14 = smov [#allocation5]  }
   0x3   :  { %s17_s13 = sshll.u32 %s228_s12, 4  ;;  %s26_s15 = sshll.u32 %s229_s14, 4  ;;  %s18_s13 = int_to_ptr.vmem [resolvable:$true] %s17_s13  ;;  %s27_s15 = int_to_ptr.vmem [resolvable:$true] %s26_s15 }
   0x4   :  { %s170_s16 = scalar_lea.vmem %s18_s13, 128  ;;  %p175_p1 = scmp.lt.s32.totalorder %s18_s13, %s18_s13 }
   0x5   :  { %p171_p0 = scmp.ne.s32.totalorder %s18_s13, %s170_s16  ;;  %p176_p2 = scmp.lt.s32.totalorder %s170_s16, %s170_s16 }
   0x7   :  { %p177_p3 = por %p176_p2, %p175_p1 }
   0x9   :  { %p178_p4 = pnand %p177_p3, %p171_p0 }
   0xb   :  { %181 = shalt.err (!%p178_p4)
}
   0xc   :  { %20 = dma.hbm_to_vmem [thread:$0]  %s267_s0, 128, %s18_s13, [#allocation3]  }
   0xd   :  { %s190_s19 = scalar_lea.vmem %s27_s15, 256  ;;  %p195_p6 = scmp.lt.s32.totalorder %s27_s15, %s27_s15 }
   0xe   :  { %p191_p5 = scmp.ne.s32.totalorder %s27_s15, %s190_s19  ;;  %p196_p7 = scmp.lt.s32.totalorder %s190_s19, %s190_s19 }
  0x10   :  { %p197_p8 = por %p196_p7, %p195_p6 }
  0x12   :  { %p198_p9 = pnand %p197_p8, %p191_p5 }
  0x14   :  { %201 = shalt.err (!%p198_p9)
}
  0x15   :  { %s230_s20 = smov 128   ;;  %s231_s21 = smov 8  }
  0x16   :  { %32 = dma.hbm_to_vmem [thread:$0]  %s268_s1, 256, %s27_s15, [#allocation6], %s230_s20, %s230_s20, %s231_s21  }
  0x17   :  { %222 = dma.done.wait [#allocation3], 128  }
  0x18   :  { %223 = vsyncadd [#allocation3], 4294967168 }
  0x19   :  { %224 = dma.done.wait [#allocation6], 256  }
  0x1a   :  { %225 = vsyncadd [#allocation6], 4294967040  ;;  %v232_v0 = vmov 0.0   ;;  %vm233_vm0 = vmmov 0   ;;  %v43_v1 = vld [vmem:[#allocation5 + $0x8] sm:$0xff]  ;;  %v42_v2 = vld [vmem:[#allocation5] sm:$0xff] }
  0x1b   :  { %148 = vmatprep.subr.mxu0 %v232_v0  ;;  %152 = vmatprep.mubr.msk.f32.mxu0 %vm233_vm0, %v232_v0  ;;  %v41_v3 = vld [vmem:[#allocation2] sm:$0xff]  ;;  %vm44_vm1 = vcmask 130048   ;;  %s234_s1 = smov [#allocation7]  }
  0x1c   :  { %149 = vmatpush3.msra.mxu0 %v43_v1  ;;  %v144_v4 = vld [vmem:[%s269_s2] ss:$0 sm:$0xff]  ;;  %s133_s25 = sshll.u32 %s234_s1, 4  ;;  %s134_s25 = int_to_ptr.vmem [resolvable:$true] %s133_s25 }
  0x1d   :  { %150 = vmatprep.subr.mxu0 %v232_v0  ;;  %s202_s26 = scalar_lea.vmem %s134_s25, 128  ;;  %p207_p11 = scmp.lt.s32.totalorder %s134_s25, %s134_s25 }
  0x1e   :  { %151 = vmatpush3.msra.mxu0 %v42_v2  ;;  %p203_p10 = scmp.ne.s32.totalorder %s134_s25, %s202_s26  ;;  %p208_p12 = scmp.lt.s32.totalorder %s202_s26, %s202_s26 }
  0x1f   :  { %153 = vmatmul.mubr.msk.f32.vlgmr.msra.gmra.mxu0 %vm44_vm1, %v41_v3 }
  0x20   :  { %p209_p13 = por %p208_p12, %p207_p11 }
  0x22   :  { %p210_p0 = pnand %p209_p13, %p203_p10 }
  0xdf   :  { %v114_v5 = vpop.f32.mrf.mxu0 }
  0xe0   :  { %v125_v6 = vmul.f32 %v144_v4, %v114_v5 }
  0xe1   :  { %v154_v7 = vpop.f32.mrf.mxu0 }
  0xe2   :  { %126 = vst [vmem:[#allocation7] sm:$0xff] %v125_v6 }
  0xe3   :  { %213 = shalt.err (!%p210_p0)
}
  0xe4   :  { %136 = dma.vmem_to_hbm [thread:$0]  %s134_s25, 128, %s270_s3, [#allocation4]  }
  0xe5   :  { %226 = dma.done.wait [#allocation4], 128  }
  0xe6   :  { %227 = vsyncadd [#allocation4], 4294967168 }
  0xe7   :  { %140 = vsyncpa [#allocation3], 1 }
  0xe8   :  { %141 = vsyncpa [#allocation6], 1 }
  0xe9   :  { %142 = vsyncpa [#allocation4], 1 }

</bundles_post_ra>
